<compile_context>
chip_gen: v7x
topology: tpu7x:2x2x1
jax: 0.10.0
libtpu: 0.0.40
codegen_flags: <defaults>
</compile_context>

<pallas_src>
import jax
import jax.numpy as jnp
from jax.experimental import pallas as pl
from jax.experimental.pallas import tpu as pltpu


HIDDEN = 10            # units[0]
LANES = 128            # lane width: collocation points live on the lane axis
MAX_TILE_ROWS = 4096   # 4096*128*4 B = 2 MiB per block; ~7 live tiles ~= 14 MiB VMEM


def _round_up(v, m):
    return ((v + m - 1) // m) * m


def _softplus(h):
    # torch.nn.Softplus(beta=1, threshold=20): softplus(x)=log1p(exp(x)),
    # linear for x > 20.  exp() may overflow to inf in the discarded branch
    # for very large h, but the where() still selects h there, so no NaNs.
    # TODO(synk): on v6e/v7x the EUP chain could run in bf16 (~2x on the
    # binding slot) at the cost of ~3 significant digits; kept f32 here.
    return jnp.where(h > 20.0, h, jnp.log1p(jnp.exp(h)))


def mlp_disp_kernel(w1_ref, b1_ref, w2_ref, b2_ref, x_ref, u_ref):
    # x_ref/u_ref: (tile_rows, 128) f32 blocks, collocation points lane-dense.
    # w1_ref/b1_ref/w2_ref: (10,) f32 in SMEM; b2_ref: (1,) f32 in SMEM.
    x = x_ref[...]                                     # (T, 128)

    # Linear(1,10) -> Softplus -> Linear(10,1) as an unrolled scalar-weight
    # accumulation (VALU + EUP only; no MXU, no XLU reduction).
    z = _softplus(x * w1_ref[0] + b1_ref[0]) * w2_ref[0]
    for k in range(1, HIDDEN):                         # static unroll, 10 units
        z = z + _softplus(x * w1_ref[k] + b1_ref[k]) * w2_ref[k]

    # Displacement: u = (x - 1) * x * (z + b2)  (b2 folded into the epilogue).
    u_ref[...] = (x - 1.0) * x * (z + b2_ref[0])


def get_displacement(x, w1, b1, w2, b2):
    """x: (N, 1) f32.  w1: (10, 1), b1: (10,), w2: (1, 10), b2: (1,)  (torch layout)."""
    x = jnp.asarray(x, jnp.float32)
    orig_shape = x.shape
    x_flat = x.reshape(-1)
    n = x_flat.shape[0]

    rows = pl.cdiv(n, LANES)
    n_lane_padded = rows * LANES

    # Zero-copy fast path when N is a whole number of 128-lane rows; otherwise
    # a single unavoidable pad (and a single slice on the way out).
    if n_lane_padded == n:
        x2d = x_flat.reshape(rows, LANES)
    else:
        x2d = jnp.zeros((n_lane_padded,), jnp.float32).at[:n].set(x_flat)
        x2d = x2d.reshape(rows, LANES)

    # Tile selection: multiple of 8 sublanes, capped at MAX_TILE_ROWS, and
    # clamped so the grid has >= 2 steps whenever rows > 8 (v7x megacore).
    if rows > 8:
        tile_rows = min(MAX_TILE_ROWS, _round_up(pl.cdiv(rows, 2), 8))
    else:
        tile_rows = _round_up(rows, 8)
    grid = (pl.cdiv(rows, tile_rows),)

    # Tiny parameters as flat SMEM vectors (resident, scalar-broadcast in-kernel).
    w1_v = jnp.asarray(w1, jnp.float32).reshape(-1)    # (10,)
    b1_v = jnp.asarray(b1, jnp.float32).reshape(-1)    # (10,)
    w2_v = jnp.asarray(w2, jnp.float32).reshape(-1)    # (10,)
    b2_v = jnp.asarray(b2, jnp.float32).reshape(-1)    # (1,)

    smem = pl.BlockSpec(memory_space=pltpu.MemorySpace.SMEM)
    tile_spec = pl.BlockSpec((tile_rows, LANES), lambda i: (i, 0))

    u2d = pl.pallas_call(
        mlp_disp_kernel,
        out_shape=jax.ShapeDtypeStruct((rows, LANES), jnp.float32),
        grid=grid,
        in_specs=[smem, smem, smem, smem, tile_spec],
        out_specs=tile_spec,
        compiler_params=pltpu.CompilerParams(
            dimension_semantics=("parallel",),        # megacore split on v7x
            vmem_limit_bytes=32 * 1024 * 1024,        # ample for 2 MiB blocks, safe on v7x
        ),
    )(w1_v, b1_v, w2_v, b2_v, x2d)

    u_flat = u2d.reshape(-1)
    if n_lane_padded != n:
        u_flat = u_flat[:n]
    return u_flat.reshape(orig_shape)


def _init_params(key):
    """Deterministic init mimicking torch.nn.Linear (uniform(-1/sqrt(fan_in), +))."""
    k1, k2, k3, k4 = jax.random.split(key, 4)
    bound1 = 1.0 / jnp.sqrt(1.0)    # fan_in = 1
    bound2 = 1.0 / jnp.sqrt(10.0)   # fan_in = 10
    w1 = jax.random.uniform(k1, (HIDDEN, 1), jnp.float32, -bound1, bound1)
    b1 = jax.random.uniform(k2, (HIDDEN,), jnp.float32, -bound1, bound1)
    w2 = jax.random.uniform(k3, (1, HIDDEN), jnp.float32, -bound2, bound2)
    b2 = jax.random.uniform(k4, (1,), jnp.float32, -bound2, bound2)
    return w1, b1, w2, b2


def _reference(x, w1, b1, w2, b2):
    """Plain-JAX reference of the same forward (for a sanity check)."""
    h = x @ w1.T + b1
    h = jnp.where(h > 20.0, h, jnp.log1p(jnp.exp(jnp.minimum(h, 20.0))))
    z = h @ w2.T + b2
    return (x - 1.0) * x * z


if __name__ == "__main__":
    key = jax.random.PRNGKey(0)
    kx1, kx2, kp = jax.random.split(key, 3)

    w1, b1, w2, b2 = _init_params(kp)
    disp_fn = jax.jit(get_displacement)

    # Case 1: ragged N (not a multiple of 128) -> exercises the pad/slice path
    # and the masked boundary block.
    N1 = 300
    x1 = jax.random.uniform(kx1, (N1, 1), jnp.float32)
    u1 = jax.block_until_ready(disp_fn(x1, w1, b1, w2, b2))
    assert u1.shape == (N1, 1)
    assert jnp.allclose(u1, _reference(x1, w1, b1, w2, b2), atol=1e-5, rtol=1e-5)

    # Case 2: lane-aligned N (multiple of 128) -> zero-copy fast path, 2 grid
    # steps so both v7x TensorCores get work.
    N2 = 2048
    x2 = jax.random.uniform(kx2, (N2, 1), jnp.float32)
    u2 = jax.block_until_ready(disp_fn(x2, w1, b1, w2, b2))
    assert u2.shape == (N2, 1)
    assert jnp.allclose(u2, _reference(x2, w1, b1, w2, b2), atol=1e-5, rtol=1e-5)

    print("KERNEL_OK")
</pallas_src>

<mosaic_0001>
module attributes {stable_mosaic.version = 11 : i64} {
  func.func @mlp_disp_kernel(%arg0: i32, %arg1: memref<10xf32, #tpu.memory_space<smem>>, %arg2: memref<10xf32, #tpu.memory_space<smem>>, %arg3: memref<10xf32, #tpu.memory_space<smem>>, %arg4: memref<1xf32, #tpu.memory_space<smem>>, %arg5: memref<8x128xf32, #tpu.memory_space<vmem>>, %arg6: memref<8x128xf32, #tpu.memory_space<vmem>>) attributes {dimension_semantics = [#tpu.dimension_semantics<parallel>], iteration_bounds = array<i64: 1>, scalar_prefetch = 0 : i64, scratch_operands = 0 : i64, tpu.core_type = #tpu.core_type<tc>, window_params = [{transform_indices = @transform_0, window_bounds = array<i64: 10>}, {transform_indices = @transform_1, window_bounds = array<i64: 10>}, {transform_indices = @transform_2, window_bounds = array<i64: 10>}, {transform_indices = @transform_3, window_bounds = array<i64: 1>}, {transform_indices = @transform_4, window_bounds = array<i64: 8, 128>}, {transform_indices = @transform_5, window_bounds = array<i64: 8, 128>}]} {
    %c0 = arith.constant 0 : index
    %c0_0 = arith.constant 0 : index
    %0 = vector.load %arg5[%c0, %c0_0] : memref<8x128xf32, #tpu.memory_space<vmem>>, vector<8x128xf32>
    %c0_1 = arith.constant 0 : index
    %1 = memref.load %arg1[%c0_1] : memref<10xf32, #tpu.memory_space<smem>>
    %2 = vector.broadcast %1 : f32 to vector<8x128xf32>
    %3 = arith.mulf %0, %2 : vector<8x128xf32>
    %c0_2 = arith.constant 0 : index
    %4 = memref.load %arg2[%c0_2] : memref<10xf32, #tpu.memory_space<smem>>
    %5 = vector.broadcast %4 : f32 to vector<8x128xf32>
    %6 = arith.addf %3, %5 : vector<8x128xf32>
    %cst = arith.constant 2.000000e+01 : f32
    %7 = vector.broadcast %cst : f32 to vector<8x128xf32>
    %8 = arith.cmpf ogt, %6, %7 : vector<8x128xf32>
    %9 = math.exp %6 : vector<8x128xf32>
    %10 = math.log1p %9 : vector<8x128xf32>
    %11 = arith.select %8, %6, %10 : vector<8x128xi1>, vector<8x128xf32>
    %c0_3 = arith.constant 0 : index
    %12 = memref.load %arg3[%c0_3] : memref<10xf32, #tpu.memory_space<smem>>
    %13 = vector.broadcast %12 : f32 to vector<8x128xf32>
    %14 = arith.mulf %11, %13 : vector<8x128xf32>
    %c1 = arith.constant 1 : index
    %15 = memref.load %arg1[%c1] : memref<10xf32, #tpu.memory_space<smem>>
    %16 = vector.broadcast %15 : f32 to vector<8x128xf32>
    %17 = arith.mulf %0, %16 : vector<8x128xf32>
    %c1_4 = arith.constant 1 : index
    %18 = memref.load %arg2[%c1_4] : memref<10xf32, #tpu.memory_space<smem>>
    %19 = vector.broadcast %18 : f32 to vector<8x128xf32>
    %20 = arith.addf %17, %19 : vector<8x128xf32>
    %cst_5 = arith.constant 2.000000e+01 : f32
    %21 = vector.broadcast %cst_5 : f32 to vector<8x128xf32>
    %22 = arith.cmpf ogt, %20, %21 : vector<8x128xf32>
    %23 = math.exp %20 : vector<8x128xf32>
    %24 = math.log1p %23 : vector<8x128xf32>
    %25 = arith.select %22, %20, %24 : vector<8x128xi1>, vector<8x128xf32>
    %c1_6 = arith.constant 1 : index
    %26 = memref.load %arg3[%c1_6] : memref<10xf32, #tpu.memory_space<smem>>
    %27 = vector.broadcast %26 : f32 to vector<8x128xf32>
    %28 = arith.mulf %25, %27 : vector<8x128xf32>
    %29 = arith.addf %14, %28 : vector<8x128xf32>
    %c2 = arith.constant 2 : index
    %30 = memref.load %arg1[%c2] : memref<10xf32, #tpu.memory_space<smem>>
    %31 = vector.broadcast %30 : f32 to vector<8x128xf32>
    %32 = arith.mulf %0, %31 : vector<8x128xf32>
    %c2_7 = arith.constant 2 : index
    %33 = memref.load %arg2[%c2_7] : memref<10xf32, #tpu.memory_space<smem>>
    %34 = vector.broadcast %33 : f32 to vector<8x128xf32>
    %35 = arith.addf %32, %34 : vector<8x128xf32>
    %cst_8 = arith.constant 2.000000e+01 : f32
    %36 = vector.broadcast %cst_8 : f32 to vector<8x128xf32>
    %37 = arith.cmpf ogt, %35, %36 : vector<8x128xf32>
    %38 = math.exp %35 : vector<8x128xf32>
    %39 = math.log1p %38 : vector<8x128xf32>
    %40 = arith.select %37, %35, %39 : vector<8x128xi1>, vector<8x128xf32>
    %c2_9 = arith.constant 2 : index
    %41 = memref.load %arg3[%c2_9] : memref<10xf32, #tpu.memory_space<smem>>
    %42 = vector.broadcast %41 : f32 to vector<8x128xf32>
    %43 = arith.mulf %40, %42 : vector<8x128xf32>
    %44 = arith.addf %29, %43 : vector<8x128xf32>
    %c3 = arith.constant 3 : index
    %45 = memref.load %arg1[%c3] : memref<10xf32, #tpu.memory_space<smem>>
    %46 = vector.broadcast %45 : f32 to vector<8x128xf32>
    %47 = arith.mulf %0, %46 : vector<8x128xf32>
    %c3_10 = arith.constant 3 : index
    %48 = memref.load %arg2[%c3_10] : memref<10xf32, #tpu.memory_space<smem>>
    %49 = vector.broadcast %48 : f32 to vector<8x128xf32>
    %50 = arith.addf %47, %49 : vector<8x128xf32>
    %cst_11 = arith.constant 2.000000e+01 : f32
    %51 = vector.broadcast %cst_11 : f32 to vector<8x128xf32>
    %52 = arith.cmpf ogt, %50, %51 : vector<8x128xf32>
    %53 = math.exp %50 : vector<8x128xf32>
    %54 = math.log1p %53 : vector<8x128xf32>
    %55 = arith.select %52, %50, %54 : vector<8x128xi1>, vector<8x128xf32>
    %c3_12 = arith.constant 3 : index
    %56 = memref.load %arg3[%c3_12] : memref<10xf32, #tpu.memory_space<smem>>
    %57 = vector.broadcast %56 : f32 to vector<8x128xf32>
    %58 = arith.mulf %55, %57 : vector<8x128xf32>
    %59 = arith.addf %44, %58 : vector<8x128xf32>
    %c4 = arith.constant 4 : index
    %60 = memref.load %arg1[%c4] : memref<10xf32, #tpu.memory_space<smem>>
    %61 = vector.broadcast %60 : f32 to vector<8x128xf32>
    %62 = arith.mulf %0, %61 : vector<8x128xf32>
    %c4_13 = arith.constant 4 : index
    %63 = memref.load %arg2[%c4_13] : memref<10xf32, #tpu.memory_space<smem>>
    %64 = vector.broadcast %63 : f32 to vector<8x128xf32>
    %65 = arith.addf %62, %64 : vector<8x128xf32>
    %cst_14 = arith.constant 2.000000e+01 : f32
    %66 = vector.broadcast %cst_14 : f32 to vector<8x128xf32>
    %67 = arith.cmpf ogt, %65, %66 : vector<8x128xf32>
    %68 = math.exp %65 : vector<8x128xf32>
    %69 = math.log1p %68 : vector<8x128xf32>
    %70 = arith.select %67, %65, %69 : vector<8x128xi1>, vector<8x128xf32>
    %c4_15 = arith.constant 4 : index
    %71 = memref.load %arg3[%c4_15] : memref<10xf32, #tpu.memory_space<smem>>
    %72 = vector.broadcast %71 : f32 to vector<8x128xf32>
    %73 = arith.mulf %70, %72 : vector<8x128xf32>
    %74 = arith.addf %59, %73 : vector<8x128xf32>
    %c5 = arith.constant 5 : index
    %75 = memref.load %arg1[%c5] : memref<10xf32, #tpu.memory_space<smem>>
    %76 = vector.broadcast %75 : f32 to vector<8x128xf32>
    %77 = arith.mulf %0, %76 : vector<8x128xf32>
    %c5_16 = arith.constant 5 : index
    %78 = memref.load %arg2[%c5_16] : memref<10xf32, #tpu.memory_space<smem>>
    %79 = vector.broadcast %78 : f32 to vector<8x128xf32>
    %80 = arith.addf %77, %79 : vector<8x128xf32>
    %cst_17 = arith.constant 2.000000e+01 : f32
    %81 = vector.broadcast %cst_17 : f32 to vector<8x128xf32>
    %82 = arith.cmpf ogt, %80, %81 : vector<8x128xf32>
    %83 = math.exp %80 : vector<8x128xf32>
    %84 = math.log1p %83 : vector<8x128xf32>
    %85 = arith.select %82, %80, %84 : vector<8x128xi1>, vector<8x128xf32>
    %c5_18 = arith.constant 5 : index
    %86 = memref.load %arg3[%c5_18] : memref<10xf32, #tpu.memory_space<smem>>
    %87 = vector.broadcast %86 : f32 to vector<8x128xf32>
    %88 = arith.mulf %85, %87 : vector<8x128xf32>
    %89 = arith.addf %74, %88 : vector<8x128xf32>
    %c6 = arith.constant 6 : index
    %90 = memref.load %arg1[%c6] : memref<10xf32, #tpu.memory_space<smem>>
    %91 = vector.broadcast %90 : f32 to vector<8x128xf32>
    %92 = arith.mulf %0, %91 : vector<8x128xf32>
    %c6_19 = arith.constant 6 : index
    %93 = memref.load %arg2[%c6_19] : memref<10xf32, #tpu.memory_space<smem>>
    %94 = vector.broadcast %93 : f32 to vector<8x128xf32>
    %95 = arith.addf %92, %94 : vector<8x128xf32>
    %cst_20 = arith.constant 2.000000e+01 : f32
    %96 = vector.broadcast %cst_20 : f32 to vector<8x128xf32>
    %97 = arith.cmpf ogt, %95, %96 : vector<8x128xf32>
    %98 = math.exp %95 : vector<8x128xf32>
    %99 = math.log1p %98 : vector<8x128xf32>
    %100 = arith.select %97, %95, %99 : vector<8x128xi1>, vector<8x128xf32>
    %c6_21 = arith.constant 6 : index
    %101 = memref.load %arg3[%c6_21] : memref<10xf32, #tpu.memory_space<smem>>
    %102 = vector.broadcast %101 : f32 to vector<8x128xf32>
    %103 = arith.mulf %100, %102 : vector<8x128xf32>
    %104 = arith.addf %89, %103 : vector<8x128xf32>
    %c7 = arith.constant 7 : index
    %105 = memref.load %arg1[%c7] : memref<10xf32, #tpu.memory_space<smem>>
    %106 = vector.broadcast %105 : f32 to vector<8x128xf32>
    %107 = arith.mulf %0, %106 : vector<8x128xf32>
    %c7_22 = arith.constant 7 : index
    %108 = memref.load %arg2[%c7_22] : memref<10xf32, #tpu.memory_space<smem>>
    %109 = vector.broadcast %108 : f32 to vector<8x128xf32>
    %110 = arith.addf %107, %109 : vector<8x128xf32>
    %cst_23 = arith.constant 2.000000e+01 : f32
    %111 = vector.broadcast %cst_23 : f32 to vector<8x128xf32>
    %112 = arith.cmpf ogt, %110, %111 : vector<8x128xf32>
    %113 = math.exp %110 : vector<8x128xf32>
    %114 = math.log1p %113 : vector<8x128xf32>
    %115 = arith.select %112, %110, %114 : vector<8x128xi1>, vector<8x128xf32>
    %c7_24 = arith.constant 7 : index
    %116 = memref.load %arg3[%c7_24] : memref<10xf32, #tpu.memory_space<smem>>
    %117 = vector.broadcast %116 : f32 to vector<8x128xf32>
    %118 = arith.mulf %115, %117 : vector<8x128xf32>
    %119 = arith.addf %104, %118 : vector<8x128xf32>
    %c8 = arith.constant 8 : index
    %120 = memref.load %arg1[%c8] : memref<10xf32, #tpu.memory_space<smem>>
    %121 = vector.broadcast %120 : f32 to vector<8x128xf32>
    %122 = arith.mulf %0, %121 : vector<8x128xf32>
    %c8_25 = arith.constant 8 : index
    %123 = memref.load %arg2[%c8_25] : memref<10xf32, #tpu.memory_space<smem>>
    %124 = vector.broadcast %123 : f32 to vector<8x128xf32>
    %125 = arith.addf %122, %124 : vector<8x128xf32>
    %cst_26 = arith.constant 2.000000e+01 : f32
    %126 = vector.broadcast %cst_26 : f32 to vector<8x128xf32>
    %127 = arith.cmpf ogt, %125, %126 : vector<8x128xf32>
    %128 = math.exp %125 : vector<8x128xf32>
    %129 = math.log1p %128 : vector<8x128xf32>
    %130 = arith.select %127, %125, %129 : vector<8x128xi1>, vector<8x128xf32>
    %c8_27 = arith.constant 8 : index
    %131 = memref.load %arg3[%c8_27] : memref<10xf32, #tpu.memory_space<smem>>
    %132 = vector.broadcast %131 : f32 to vector<8x128xf32>
    %133 = arith.mulf %130, %132 : vector<8x128xf32>
    %134 = arith.addf %119, %133 : vector<8x128xf32>
    %c9 = arith.constant 9 : index
    %135 = memref.load %arg1[%c9] : memref<10xf32, #tpu.memory_space<smem>>
    %136 = vector.broadcast %135 : f32 to vector<8x128xf32>
    %137 = arith.mulf %0, %136 : vector<8x128xf32>
    %c9_28 = arith.constant 9 : index
    %138 = memref.load %arg2[%c9_28] : memref<10xf32, #tpu.memory_space<smem>>
    %139 = vector.broadcast %138 : f32 to vector<8x128xf32>
    %140 = arith.addf %137, %139 : vector<8x128xf32>
    %cst_29 = arith.constant 2.000000e+01 : f32
    %141 = vector.broadcast %cst_29 : f32 to vector<8x128xf32>
    %142 = arith.cmpf ogt, %140, %141 : vector<8x128xf32>
    %143 = math.exp %140 : vector<8x128xf32>
    %144 = math.log1p %143 : vector<8x128xf32>
    %145 = arith.select %142, %140, %144 : vector<8x128xi1>, vector<8x128xf32>
    %c9_30 = arith.constant 9 : index
    %146 = memref.load %arg3[%c9_30] : memref<10xf32, #tpu.memory_space<smem>>
    %147 = vector.broadcast %146 : f32 to vector<8x128xf32>
    %148 = arith.mulf %145, %147 : vector<8x128xf32>
    %149 = arith.addf %134, %148 : vector<8x128xf32>
    %cst_31 = arith.constant 1.000000e+00 : f32
    %150 = vector.broadcast %cst_31 : f32 to vector<8x128xf32>
    %151 = arith.subf %0, %150 : vector<8x128xf32>
    %152 = arith.mulf %151, %0 : vector<8x128xf32>
    %c0_32 = arith.constant 0 : index
    %153 = memref.load %arg4[%c0_32] : memref<1xf32, #tpu.memory_space<smem>>
    %154 = vector.broadcast %153 : f32 to vector<8x128xf32>
    %155 = arith.addf %149, %154 : vector<8x128xf32>
    %156 = arith.mulf %152, %155 : vector<8x128xf32>
    %c0_33 = arith.constant 0 : index
    %c0_34 = arith.constant 0 : index
    %157 = vector.load %arg6[%c0_33, %c0_34] : memref<8x128xf32, #tpu.memory_space<vmem>>, vector<8x128xf32>
    tpu.vector_store %arg6[%c0_33, %c0_34], %156 {strides = array<i32>} : memref<8x128xf32, #tpu.memory_space<vmem>>, vector<8x128xf32>,
    return
  }
  func.func @transform_0(%arg0: i32) -> i32 {
    %c0_i32 = arith.constant 0 : i32
    %c0_i32_0 = arith.constant 0 : i32
    return %c0_i32 : i32
  }
  func.func @transform_1(%arg0: i32) -> i32 {
    %c0_i32 = arith.constant 0 : i32
    %c0_i32_0 = arith.constant 0 : i32
    return %c0_i32 : i32
  }
  func.func @transform_2(%arg0: i32) -> i32 {
    %c0_i32 = arith.constant 0 : i32
    %c0_i32_0 = arith.constant 0 : i32
    return %c0_i32 : i32
  }
  func.func @transform_3(%arg0: i32) -> i32 {
    %c0_i32 = arith.constant 0 : i32
    %c0_i32_0 = arith.constant 0 : i32
    return %c0_i32 : i32
  }
  func.func @transform_4(%arg0: i32) -> (i32, i32) {
    %c0_i32 = arith.constant 0 : i32
    %c0_i32_0 = arith.constant 0 : i32
    return %arg0, %c0_i32 : i32, i32
  }
  func.func @transform_5(%arg0: i32) -> (i32, i32) {
    %c0_i32 = arith.constant 0 : i32
    %c0_i32_0 = arith.constant 0 : i32
    return %arg0, %c0_i32 : i32, i32
  }
}

</mosaic_0001>

<bundles_post_ra>
// kernel: get_displacement.1
= control target key start
LH: loop header
LB: loop body
LE: loop exit
PB: predicated region body
PF: predicated region fallthrough
CT: control target
= control target key end

     0   :  { %11 = vsyncpa [#allocation4], 0  ;;  %s690_s0 = inlined_call_operand.vmem [shape: f32[10], index: 0, kind: input, shape index: {}]   ;;  %s691_s1 = inlined_call_operand.vmem [shape: f32[10], index: 1, kind: input, shape index: {}]   ;;  %s692_s2 = inlined_call_operand.vmem [shape: f32[10], index: 2, kind: input, shape index: {}]   ;;  %s693_s3 = inlined_call_operand.<no memory space> [shape: f32[1], index: 3, kind: input, shape index: {}]   ;;  %s694_s4 = inlined_call_operand.vmem [shape: f32[3,128], index: 4, kind: input, shape index: {}]   ;;  %s695_s5 = inlined_call_operand.vmem [shape: f32[3,128], index: 5, kind: output, shape index: {}]  }
   0x1   :  { %12 = vsyncpa [#allocation6], 0  ;;  %s29_s20 = sshll.u32 %s691_s1, 4  ;;  %s19_s23 = sshll.u32 %s690_s0, 4  ;;  %s30_s20 = int_to_ptr.vmem [resolvable:$true] %s29_s20  ;;  %s20_s23 = int_to_ptr.vmem [resolvable:$true] %s19_s23 }
   0x2   :  { %s406_s24 = scalar_lea.vmem %s30_s20, 16  ;;  %p411_p1 = scmp.lt.s32.totalorder %s30_s20, %s30_s20 }
   0x3   :  { %p407_p0 = scmp.ne.s32.totalorder %s30_s20, %s406_s24  ;;  %p412_p2 = scmp.lt.s32.totalorder %s406_s24, %s406_s24 }
   0x5   :  { %p413_p3 = por %p412_p2, %p411_p1 }
   0x7   :  { %p414_p4 = pnand %p413_p3, %p407_p0 }
   0x9   :  { %417 = shalt.err (!%p414_p4)
}
   0xa   :  { %s446_s25 = smov [#allocation5]   ;;  %s418_s26 = scalar_lea.vmem %s20_s23, 16 }
   0xb   :  { %32 = dma.vmem_to_smem %s30_s20, 16, %s446_s25, [#allocation6]  }
   0xc   :  { %p419_p5 = scmp.ne.s32.totalorder %s20_s23, %s418_s26  ;;  %p423_p6 = scmp.lt.s32.totalorder %s20_s23, %s20_s23 }
   0xd   :  { %p424_p7 = scmp.lt.s32.totalorder %s418_s26, %s418_s26 }
   0xf   :  { %p425_p8 = por %p424_p7, %p423_p6 }
  0x11   :  { %p426_p9 = pnand %p425_p8, %p419_p5 }
  0x13   :  { %429 = shalt.err (!%p426_p9)
}
  0x14   :  { %s447_s1 = smov [#allocation3]   ;;  %s39_s28 = sshll.u32 %s692_s2, 4  ;;  %s40_s28 = int_to_ptr.vmem [resolvable:$true] %s39_s28 }
  0x15   :  { %22 = dma.vmem_to_smem %s20_s23, 16, %s447_s1, [#allocation4]  }
  0x16   :  { %s430_s29 = scalar_lea.vmem %s40_s28, 16  ;;  %p435_p11 = scmp.lt.s32.totalorder %s40_s28, %s40_s28 }
  0x17   :  { %p431_p10 = scmp.ne.s32.totalorder %s40_s28, %s430_s29  ;;  %p436_p12 = scmp.lt.s32.totalorder %s430_s29, %s430_s29 }
  0x19   :  { %p437_p13 = por %p436_p12, %p435_p11 }
  0x1b   :  { %p438_p0 = pnand %p437_p13, %p431_p10 }
  0x1d   :  { %441 = shalt.err (!%p438_p0)
}
  0x1e   :  { %s448_s30 = smov [#allocation7]  }
  0x1f   :  { %42 = dma.vmem_to_smem %s40_s28, 16, %s448_s30, [#allocation6]  }
  0x20   :  { %442 = dma.done.wait [#allocation4], 16  }
  0x21   :  { %443 = vsyncadd [#allocation4], 4294967280 }
  0x22   :  { %444 = dma.done.wait [#allocation6], 32  }
  0x23   :  { %445 = vsyncadd [#allocation6], 4294967264 }
  0x24   :  { %56 = sfence }
  0x25   :  { %s58_s6 = sld [smem:[#allocation3]]  ;;  %s335_s8 = sld [smem:[#allocation3 + $0x1]]  ;;  %v491_v0 = vld [vmem:[%s694_s4] sm:$0xff] }
  0x26   :  { %s61_s7 = sld [smem:[#allocation5]]  ;;  %s336_s9 = sld [smem:[#allocation5 + $0x1]] }
  0x27   :  { %s338_s2 = sld [smem:[#allocation3 + $0x2]]  ;;  %s341_s13 = sld [smem:[#allocation3 + $0x3]] }
  0x28   :  { %s339_s10 = sld [smem:[#allocation5 + $0x2]]  ;;  %s342_s14 = sld [smem:[#allocation5 + $0x3]] }
  0x29   :  { %s344_s15 = sld [smem:[#allocation3 + $0x4]]  ;;  %s496_s17 = sld [smem:[#allocation3 + $0x5]] }
  0x2a   :  { %s493_s16 = sld [smem:[#allocation5 + $0x4]]  ;;  %s499_s18 = sld [smem:[#allocation5 + $0x5]] }
  0x2b   :  { %v59_v1 = vstv %s58_s6  ;;  %v81_v4 = vstv %s335_s8  ;;  %s503_s4 = sld [smem:[#allocation3 + $0x6]]  ;;  %s512_s20 = sld [smem:[#allocation3 + $0x7]] }
  0x2c   :  { %v62_v2 = vstv %s61_s7  ;;  %v60_v3 = vmul.f32 %v59_v1, %v491_v0  ;;  %v82_v5 = vmul.f32 %v81_v4, %v491_v0  ;;  %v84_v6 = vstv %s336_s9  ;;  %s505_s19 = sld [smem:[#allocation5 + $0x6]]  ;;  %s520_s21 = sld [smem:[#allocation5 + $0x7]] }
  0x2d   :  { %v104_v8 = vstv %s338_s2  ;;  %v127_v12 = vstv %s341_s13  ;;  %s526_s22 = sld [smem:[#allocation7]]  ;;  %s532_s23 = sld [smem:[#allocation7 + $0x1]] }
  0x2e   :  { %v501_v7 = vadd.f32 %v62_v2, %v60_v3  ;;  %v107_v9 = vstv %s339_s10  ;;  %v507_v10 = vadd.f32 %v84_v6, %v82_v5  ;;  %v105_v11 = vmul.f32 %v104_v8, %v491_v0  ;;  %s534_s24 = sld [smem:[#allocation7 + $0x2]]  ;;  %s542_s25 = sld [smem:[#allocation3 + $0x8]] }
  0x2f   :  { %v128_v14 = vmul.f32 %v127_v12, %v491_v0  ;;  %v130_v15 = vstv %s342_s14  ;;  %v150_v19 = vstv %s344_s15  ;;  %v173_v24 = vstv %s496_s17  ;;  %s544_s26 = sld [smem:[#allocation7 + $0x3]]  ;;  %s550_s1 = sld [smem:[#allocation5 + $0x8]] }
  0x30   :  { %v65_v13 = vmul.f32 1.442695, %v501_v7  ;;  %v87_v16 = vmul.f32 1.442695, %v507_v10  ;;  %v515_v17 = vadd.f32 %v107_v9, %v105_v11  ;;  %v153_v20 = vstv %s493_s16  ;;  %s554_s0 = sld [smem:[#allocation3 + $0x9]]  ;;  %s602_s28 = sld [smem:[#allocation7 + $0x4]] }
  0x31   :  { %v517_v18 = vadd.f32 %v130_v15, %v128_v14  ;;  %v151_v22 = vmul.f32 %v150_v19, %v491_v0  ;;  %v174_v26 = vmul.f32 %v173_v24, %v491_v0  ;;  %v176_v27 = vstv %s499_s18  ;;  %s557_s27 = sld [smem:[#allocation5 + $0x9]]  ;;  %s630_s29 = sld [smem:[#allocation7 + $0x5]] }
  0x32   :  { %366 = vpow2.f32 %v65_v13  ;;  %v110_v21 = vmul.f32 1.442695, %v515_v17  ;;  %v196_v28 = vstv %s503_s4  ;;  %v199_v29 = vstv %s505_s19  ;;  %s653_s30 = sld [smem:[#allocation7 + $0x6]]  ;;  %s668_s6 = sld [smem:[#allocation7 + $0x7]] }
  0x33   :  { %368 = vpow2.f32 %v87_v16  ;;  %v133_v23 = vmul.f32 1.442695, %v517_v18  ;;  %v528_v25 = vadd.f32 %v153_v20, %v151_v22  ;;  %v539_v31 = vadd.f32 %v176_v27, %v174_v26  ;;  %s358_s7 = sld [smem:[#allocation7 + $0x8]]  ;;  %s361_s8 = sld [smem:[#allocation7 + $0x9]] }
  0x34   :  { %370 = vpow2.f32 %v110_v21  ;;  %v197_v32 = vmul.f32 %v196_v28, %v491_v0  ;;  %v219_v33 = vstv %s512_s20  ;;  %v222_v37 = vstv %s520_s21 }
  0x35   :  { %372 = vpow2.f32 %v133_v23  ;;  %v156_v30 = vmul.f32 1.442695, %v528_v25  ;;  %v179_v34 = vmul.f32 1.442695, %v539_v31  ;;  %v220_v36 = vmul.f32 %v219_v33, %v491_v0 }
  0x36   :  { %v548_v35 = vadd.f32 %v199_v29, %v197_v32  ;;  %v78_v42 = vstv %s526_s22  ;;  %v100_v46 = vstv %s532_s23  ;;  %v123_v47 = vstv %s534_s24 }
  0x37   :  { %374 = vpow2.f32 %v156_v30  ;;  %v560_v43 = vadd.f32 %v222_v37, %v220_v36  ;;  %v242_v51 = vstv %s542_s25  ;;  %v146_v55 = vstv %s544_s26 }
  0x38   :  { %376 = vpow2.f32 %v179_v34  ;;  %v202_v38 = vmul.f32 1.442695, %v548_v35  ;;  %v245_v59 = vstv %s550_s1  ;;  %vm64_vm0 = vcmp.gt.f32.partialorder %v501_v7, 20.0 }
  0x39   :  { %v225_v58 = vmul.f32 1.442695, %v560_v43  ;;  %v243_v61 = vmul.f32 %v242_v51, %v491_v0  ;;  %v265_v62 = vstv %s554_s0  ;;  %vm86_vm2 = vcmp.gt.f32.partialorder %v507_v10, 20.0 }
  0x3a   :  { %378 = vpow2.f32 %v202_v38  ;;  %v268_v8 = vstv %s557_s27  ;;  %vm109_vm4 = vcmp.gt.f32.partialorder %v515_v17, 20.0  ;;  %vm132_vm5 = vcmp.gt.f32.partialorder %v517_v18, 20.0 }
  0x3b   :  { %v586_v16 = vadd.f32 %v245_v59, %v243_v61  ;;  %v266_v23 = vmul.f32 %v265_v62, %v491_v0  ;;  %vm155_vm8 = vcmp.gt.f32.partialorder %v528_v25, 20.0  ;;  %vm178_vm11 = vcmp.gt.f32.partialorder %v539_v31, 20.0 }
  0x3c   :  { %v367_v39 = vpop.eup %366  ;;  %vm201_vm13 = vcmp.gt.f32.partialorder %v548_v35, 20.0  ;;  %vm224_vm15 = vcmp.gt.f32.partialorder %v560_v43, 20.0 }
  0x3d   :  { %v369_v40 = vpop.eup %368  ;;  %v67_v41 = vadd.f32 1.0, %v367_v39  ;;  %v70_v44 = vmul.f32 -0.5, %v367_v39  ;;  %v73_v49 = vand.u32 2147483647, %v367_v39  ;;  %v604_v33 = vadd.f32 %v268_v8, %v266_v23 }
  0x3e   :  { %v89_v45 = vadd.f32 1.0, %v369_v40  ;;  %v371_v48 = vpop.eup %370  ;;  %v92_v50 = vmul.f32 -0.5, %v369_v40  ;;  %v95_v53 = vand.u32 2147483647, %v369_v40  ;;  %v248_v38 = vmul.f32 1.442695, %v586_v16 }
  0x3f   :  { %380 = vlog2.f32 %v67_v41  ;;  %v373_v52 = vpop.eup %372  ;;  %v112_v54 = vadd.f32 1.0, %v371_v48  ;;  %v115_v56 = vmul.f32 -0.5, %v371_v48  ;;  %v71_v60 = vadd.f32 1.0, %v70_v44 }
  0x40   :  { %382 = vlog2.f32 %v89_v45  ;;  %v135_v57 = vadd.f32 1.0, %v373_v52  ;;  %vm571_vm1 = vcmp.lt.f32.partialorder %v73_v49, 0.0004427343  ;;  %v93_v2 = vadd.f32 1.0, %v92_v50 }
  0x41   :  { %384 = vlog2.f32 %v112_v54  ;;  %v375_v63 = vpop.eup %374  ;;  %v138_v3 = vmul.f32 -0.5, %v373_v52  ;;  %vm576_vm3 = vcmp.lt.f32.partialorder %v95_v53, 0.0004427343  ;;  %v118_v5 = vand.u32 2147483647, %v371_v48 }
  0x42   :  { %386 = vlog2.f32 %v135_v57  ;;  %v158_v6 = vadd.f32 1.0, %v375_v63  ;;  %v581_v9 = vpop.eup %376  ;;  %v116_v11 = vadd.f32 1.0, %v115_v56  ;;  %v141_v12 = vand.u32 2147483647, %v373_v52 }
  0x43   :  { %v161_v13 = vmul.f32 -0.5, %v375_v63  ;;  %388 = vpow2.f32 %v225_v58  ;;  %v164_v14 = vand.u32 2147483647, %v375_v63  ;;  %v181_v15 = vadd.f32 1.0, %v581_v9 }
  0x44   :  { %390 = vlog2.f32 %v158_v6  ;;  %v588_v19 = vpop.eup %378  ;;  %v72_v20 = vmul.f32 %v367_v39, %v71_v60  ;;  %v94_v21 = vmul.f32 %v369_v40, %v93_v2  ;;  %v139_v22 = vadd.f32 1.0, %v138_v3 }
  0x45   :  { %vm591_vm6 = vcmp.lt.f32.partialorder %v118_v5, 0.0004427343  ;;  %392 = vlog2.f32 %v181_v15  ;;  %v184_v26 = vmul.f32 -0.5, %v581_v9  ;;  %v204_v27 = vadd.f32 1.0, %v588_v19 }
  0x46   :  { %v117_v29 = vmul.f32 %v371_v48, %v116_v11  ;;  %vm597_vm7 = vcmp.lt.f32.partialorder %v141_v12, 0.0004427343  ;;  %v162_v32 = vadd.f32 1.0, %v161_v13  ;;  %vm606_vm9 = vcmp.lt.f32.partialorder %v164_v14, 0.0004427343 }
  0x47   :  { %394 = vlog2.f32 %v204_v27  ;;  %v140_v40 = vmul.f32 %v373_v52, %v139_v22  ;;  %v187_v41 = vand.u32 2147483647, %v581_v9  ;;  %v207_v44 = vmul.f32 -0.5, %v588_v19 }
  0x48   :  { %v185_v49 = vadd.f32 1.0, %v184_v26  ;;  %396 = vpow2.f32 %v248_v38  ;;  %v271_v50 = vmul.f32 1.442695, %v604_v33  ;;  %v163_v56 = vmul.f32 %v375_v63, %v162_v32 }
  0x49   :  { %v381_v28 = vpop.eup %380  ;;  %v208_v62 = vadd.f32 1.0, %v207_v44  ;;  %v169_v12 = vstv %s602_s28  ;;  %vm647_vm10 = vcmp.lt.f32.partialorder %v187_v41, 0.0004427343 }
  0x4a   :  { %v383_v34 = vpop.eup %382  ;;  %v69_v36 = vmul.f32 0.6931472, %v381_v28  ;;  %398 = vpow2.f32 %v271_v50  ;;  %v186_v2 = vmul.f32 %v581_v9, %v185_v49  ;;  %v192_v28 = vstv %s630_s29 }
  0x4b   :  { %v91_v39 = vmul.f32 0.6931472, %v383_v34  ;;  %v385_v45 = vpop.eup %384  ;;  %v209_v15 = vmul.f32 %v588_v19, %v208_v62 }
  0x4c   :  { %v75_v48 = vsel %vm571_vm1, %v72_v20, %v69_v36  ;;  %v387_v51 = vpop.eup %386  ;;  %v114_v54 = vmul.f32 0.6931472, %v385_v45  ;;  %vm247_vm1 = vcmp.gt.f32.partialorder %v586_v16, 20.0 }
  0x4d   :  { %v76_v53 = vsel %vm64_vm0, %v501_v7, %v75_v48  ;;  %v97_v52 = vsel %vm576_vm3, %v94_v21, %v91_v39  ;;  %v137_v59 = vmul.f32 0.6931472, %v387_v51  ;;  %v389_v60 = vpop.eup %388  ;;  %v215_v39 = vstv %s653_s30 }
  0x4e   :  { %v79_v57 = vmul.f32 %v78_v42, %v76_v53  ;;  %v98_v58 = vsel %vm86_vm2, %v507_v10, %v97_v52  ;;  %v120_v7 = vsel %vm591_vm6, %v117_v29, %v114_v54  ;;  %v210_v42 = vand.u32 2147483647, %v588_v19  ;;  %v391_v63 = vpop.eup %390 }
  0x4f   :  { %v101_v61 = vmul.f32 %v100_v46, %v98_v58  ;;  %v121_v10 = vsel %vm109_vm4, %v515_v17, %v120_v7  ;;  %v143_v1 = vsel %vm597_vm7, %v140_v40, %v137_v59  ;;  %v227_v46 = vadd.f32 1.0, %v389_v60  ;;  %v393_v8 = vpop.eup %392 }
  0x50   :  { %v124_v4 = vmul.f32 %v123_v47, %v121_v10  ;;  %v144_v5 = vsel %vm132_vm5, %v517_v18, %v143_v1  ;;  %v160_v6 = vmul.f32 0.6931472, %v391_v63  ;;  %v183_v47 = vmul.f32 0.6931472, %v393_v8 }
  0x51   :  { %v102_v3 = vadd.f32 %v101_v61, %v79_v57  ;;  %v147_v11 = vmul.f32 %v146_v55, %v144_v5  ;;  %400 = vlog2.f32 %v227_v46  ;;  %v230_v14 = vmul.f32 -0.5, %v389_v60  ;;  %v395_v18 = vpop.eup %394 }
  0x52   :  { %v166_v9 = vsel %vm606_vm9, %v163_v56, %v160_v6  ;;  %v189_v20 = vsel %vm647_vm10, %v186_v2, %v183_v47  ;;  %v206_v21 = vmul.f32 0.6931472, %v395_v18  ;;  %vm662_vm12 = vcmp.lt.f32.partialorder %v210_v42, 0.0004427343  ;;  %v397_v23 = vpop.eup %396 }
  0x53   :  { %v125_v13 = vadd.f32 %v124_v4, %v102_v3  ;;  %v167_v55 = vsel %vm155_vm8, %v528_v25, %v166_v9  ;;  %v190_v27 = vsel %vm178_vm11, %v539_v31, %v189_v20  ;;  %v231_v25 = vadd.f32 1.0, %v230_v14 }
  0x54   :  { %v170_v26 = vmul.f32 %v169_v12, %v167_v55  ;;  %v250_v29 = vadd.f32 1.0, %v397_v23  ;;  %v399_v19 = vpop.eup %398  ;;  %v212_v30 = vsel %vm662_vm12, %v209_v15, %v206_v21  ;;  %v233_v32 = vand.u32 2147483647, %v389_v60 }
  0x55   :  { %v148_v24 = vadd.f32 %v147_v11, %v125_v13  ;;  %v273_v34 = vadd.f32 1.0, %v399_v19  ;;  %v193_v37 = vmul.f32 %v192_v28, %v190_v27  ;;  %v253_v38 = vmul.f32 -0.5, %v397_v23 }
  0x56   :  { %402 = vlog2.f32 %v250_v29  ;;  %v213_v31 = vsel %vm201_vm13, %v548_v35, %v212_v30  ;;  %v232_v40 = vmul.f32 %v389_v60, %v231_v25  ;;  %vm234_vm14 = vcmp.lt.f32.partialorder %v233_v32, 0.0004427343 }
  0x57   :  { %v171_v36 = vadd.f32 %v170_v26, %v148_v24  ;;  %404 = vlog2.f32 %v273_v34  ;;  %v276_v44 = vmul.f32 -0.5, %v399_v19  ;;  %v216_v49 = vmul.f32 %v215_v39, %v213_v31 }
  0x58   :  { %v254_v50 = vadd.f32 1.0, %v253_v38  ;;  %v238_v53 = vstv %s668_s6  ;;  %v256_v52 = vand.u32 2147483647, %v397_v23  ;;  %v279_v56 = vand.u32 2147483647, %v399_v19 }
  0x59   :  { %v194_v48 = vadd.f32 %v193_v37, %v171_v36  ;;  %v277_v35 = vadd.f32 1.0, %v276_v44  ;;  %v261_v42 = vstv %s358_s7  ;;  %vm270_vm3 = vcmp.gt.f32.partialorder %v604_v33, 20.0 }
  0x5a   :  { %v255_v59 = vmul.f32 %v397_v23, %v254_v50  ;;  %vm257_vm0 = vcmp.lt.f32.partialorder %v256_v52, 0.0004427343  ;;  %vm280_vm2 = vcmp.lt.f32.partialorder %v279_v56, 0.0004427343  ;;  %v284_v2 = vstv %s361_s8 }
  0x5b   :  { %v401_v41 = vpop.eup %400  ;;  %v217_v57 = vadd.f32 %v216_v49, %v194_v48  ;;  %v278_v7 = vmul.f32 %v399_v19, %v277_v35  ;;  %v362_v4 = vadd.f32 -1.0, %v491_v0  ;;  %v290_v11 = vstv %s693_s3 }
  0x5c   :  { %v229_v45 = vmul.f32 0.6931472, %v401_v41 }
  0x5d   :  { %v288_v17 = vmul.f32 %v362_v4, %v491_v0 }
  0x5e   :  { %v235_v51 = vsel %vm234_vm14, %v232_v40, %v229_v45 }
  0x5f   :  { %v236_v54 = vsel %vm224_vm15, %v560_v43, %v235_v51 }
  0x60   :  { %v239_v58 = vmul.f32 %v238_v53, %v236_v54  ;;  %v403_v60 = vpop.eup %402 }
  0x61   :  { %v252_v61 = vmul.f32 0.6931472, %v403_v60  ;;  %v405_v62 = vpop.eup %404 }
  0x62   :  { %v240_v63 = vadd.f32 %v239_v58, %v217_v57  ;;  %v275_v1 = vmul.f32 0.6931472, %v405_v62 }
  0x63   :  { %v258_v10 = vsel %vm257_vm0, %v255_v59, %v252_v61 }
  0x64   :  { %v259_v43 = vsel %vm247_vm1, %v586_v16, %v258_v10  ;;  %v281_v3 = vsel %vm280_vm2, %v278_v7, %v275_v1 }
  0x65   :  { %v262_v46 = vmul.f32 %v261_v42, %v259_v43  ;;  %v282_v5 = vsel %vm270_vm3, %v604_v33, %v281_v3 }
  0x66   :  { %v285_v8 = vmul.f32 %v284_v2, %v282_v5 }
  0x67   :  { %v263_v6 = vadd.f32 %v262_v46, %v240_v63 }
  0x69   :  { %v286_v12 = vadd.f32 %v285_v8, %v263_v6 }
  0x6b   :  { %v291_v13 = vadd.f32 %v290_v11, %v286_v12 }
  0x6d   :  { %v292_v9 = vmul.f32 %v291_v13, %v288_v17 }
  0x6f   :  { %293 = vst [vmem:[#allocation8] sm:$0xff] %v292_v9 }
  0x76   :  { %v311_v16 = vld [vmem:[#allocation8] sm:$0xf] }
  0x77   :  { %312 = vst [vmem:[%s695_s5] sm:$0xf] %v311_v16 }
  0x78   :  { %329 = vsyncpa [#allocation4], 1 }
  0x79   :  { %330 = vsyncpa [#allocation6], 1 }

</bundles_post_ra>
